<compile_context>
chip_gen: v6e
topology: v6e:2x2x1
jax: 0.10.0
libtpu: 0.0.40
codegen_flags: <defaults>
</compile_context>

<pallas_src>
import jax
import jax.numpy as jnp
from jax.experimental import pallas as pl
from jax.experimental.pallas import tpu as pltpu


_TARGET_BLOCK_BYTES = 6 * 1024 * 1024   # input block (x2 double-buffered ~12 MiB;
                                        # fits v5e's 16 MiB scoped default, v6e/v7x 32 MiB)
_MAX_LANE_TILE = 2048                   # lane (post) tile cap, multiple of 128
_MAX_K_TILE = 512                       # reduce-axis tile cap


def _choose_tiles(pre, K, post, itemsize):
    """Pick (tpre, tk, tpost) tiles for the (pre, K, post) view."""
    # dtype-native sublane multiple: 8 (32-bit), 16 (bf16/f16), 32 (int8/fp8).
    sub = max(8, 32 // itemsize)

    # Lane (post) tile: multiple of 128 for lane-dense loads/stores; small
    # post falls back to the full extent (lane-sparse, see TODO below).
    if post <= 128:
        tpost = post
    elif post % 128 == 0:
        tpost = min(post, _MAX_LANE_TILE)
    else:
        tpost = min(_MAX_LANE_TILE, (post // 128) * 128)   # tail lane tile is partial

    # Reserve the pre-tile floor (2nd-to-last dim of the 2-D output blocks)
    # UP FRONT so tk/tpost cannot overshoot the byte budget.
    tpre_min = pre if pre < sub else sub

    # K (reduce) tile within the remaining budget.
    rows_budget = max(sub, _TARGET_BLOCK_BYTES // max(1, tpre_min * tpost * itemsize))
    if K <= rows_budget:
        tk = K
    else:
        cap = max(sub, min(_MAX_K_TILE, (rows_budget // sub) * sub))
        tk = cap
        # Prefer a tk that divides K (no partial-tile masking), but don't pay
        # more than a 2x reduction in tile size for it.
        t = cap
        while t >= sub and 2 * t >= cap:
            if K % t == 0:
                tk = t
                break
            t -= sub

    # Spend whatever budget is left on pre.
    pre_budget = max(tpre_min, _TARGET_BLOCK_BYTES // max(1, tk * tpost * itemsize))
    if pre <= pre_budget:
        tpre = pre
    else:
        tpre = max(tpre_min, (pre_budget // sub) * sub)

    # Megacore: avoid a degenerate (1, 1, nk) grid when the K sweep is long,
    # otherwise the whole reduction runs on a single TensorCore (v7x has 2).
    if pre <= tpre and post <= tpost and K > tk:
        if tpost >= 256 and tpost % 256 == 0:
            tpost //= 2
        elif tpre % (2 * sub) == 0:
            tpre //= 2

    return tpre, tk, tpost


def _make_kernel(K, tk, nk, is_float, int_pad):
    """(min, argmin) over axis 1 of (tpre, tk, tpost) blocks, accumulated over kk."""
    needs_mask = (K % tk) != 0

    def kernel(x_ref, val_ref, idx_ref):
        kk = pl.program_id(2)
        x = x_ref[...]                                          # (tpre, tk, tpost)

        # Local K-row indices for this tile; the global offset kk*tk is added
        # to the already-reduced (tpre, tpost) result instead of the full tile.
        row = jax.lax.broadcasted_iota(jnp.int32, x.shape, 1)

        if needs_mask:
            # Only the last K tile is partial; padded rows sit at the tail of
            # the tile, so they can never win the first-index min below.
            limit = K - kk * tk
            pad = float("inf") if is_float else int_pad
            x = jnp.where(row < limit, x, pad)

        v_keep = jnp.min(x, axis=1, keepdims=True)              # (tpre, 1, tpost)

        if is_float:
            isn = jnp.isnan(x)
            # Explicit NaN propagation for the VALUE (torch.min semantics);
            # do not rely on the vmin lowering propagating NaN.
            nan_free = jnp.min(jnp.where(isn, 0, 1), axis=1, keepdims=True)
            v_keep = jnp.where(nan_free == 0, float("nan"), v_keep)
            # With a NaN present, `x == v_keep` is all-False, so the candidate
            # set degenerates to the NaN positions -> index of the FIRST NaN.
            cand = (x == v_keep) | isn
        else:
            cand = x == v_keep

        i_blk = jnp.min(jnp.where(cand, row, tk), axis=1)       # (tpre, tpost) int32
        v_blk = jnp.squeeze(v_keep, axis=1)                     # (tpre, tpost)

        if nk == 1:
            val_ref[...] = v_blk
            idx_ref[...] = i_blk
        else:
            i_blk = i_blk + kk * tk

            @pl.when(kk == 0)
            def _():
                val_ref[...] = v_blk
                idx_ref[...] = i_blk

            @pl.when(kk > 0)
            def _():
                cur_v = val_ref[...]
                take = v_blk < cur_v          # strict <: earlier K tile wins ties
                if is_float:
                    take = take | (jnp.isnan(v_blk) & ~jnp.isnan(cur_v))
                val_ref[...] = jnp.where(take, v_blk, cur_v)
                idx_ref[...] = jnp.where(take, i_blk, idx_ref[...])

    return kernel


def min_with_index(x, dim):
    """Equivalent of: values, indices = torch.min(x, dim).

    Indices are returned as int32 (TPU-native); PyTorch returns int64 —
    value-identical for any reduced-dim size < 2**31.
    """
    ndim = x.ndim
    dim = dim % ndim
    shape = x.shape
    K = shape[dim]

    pre = 1
    for s in shape[:dim]:
        pre *= s
    post = 1
    for s in shape[dim + 1:]:
        post *= s
    out_shape = shape[:dim] + shape[dim + 1:]

    # Zero-copy view: (pre, K, post); the kernel reduces over the MIDDLE axis
    # so the trailing `post` dims stay on lanes and the (pre, post) outputs
    # are lane-dense.
    # TODO(synk): when dim is the last axis (post == 1) this layout is
    # lane-sparse; a dedicated lane-reduce kernel would be faster there.
    x3 = x.reshape(pre, K, post)

    is_float = jnp.issubdtype(x.dtype, jnp.floating)
    itemsize = jnp.dtype(x.dtype).itemsize
    int_pad = None if is_float else int(jnp.iinfo(x.dtype).max)

    tpre, tk, tpost = _choose_tiles(pre, K, post, itemsize)
    nk = (K + tk - 1) // tk
    grid = (pl.cdiv(pre, tpre), pl.cdiv(post, tpost), nk)

    cost = pl.CostEstimate(
        flops=4 * pre * K * post,
        transcendentals=0,
        bytes_accessed=pre * K * post * itemsize + pre * post * (itemsize + 4),
    )

    values2, indices2 = pl.pallas_call(
        _make_kernel(K, tk, nk, is_float, int_pad),
        out_shape=(
            jax.ShapeDtypeStruct((pre, post), x.dtype),
            jax.ShapeDtypeStruct((pre, post), jnp.int32),
        ),
        grid_spec=pltpu.PrefetchScalarGridSpec(
            num_scalar_prefetch=0,
            grid=grid,
            in_specs=[
                pl.BlockSpec((tpre, tk, tpost), lambda p, j, kk: (p, kk, j)),
            ],
            out_specs=(
                pl.BlockSpec((tpre, tpost), lambda p, j, kk: (p, j)),
                pl.BlockSpec((tpre, tpost), lambda p, j, kk: (p, j)),
            ),
        ),
        compiler_params=pltpu.CompilerParams(
            dimension_semantics=("parallel", "parallel", "arbitrary"),
        ),
        cost_estimate=cost,
    )(x3)

    return values2.reshape(out_shape), indices2.reshape(out_shape)


if __name__ == "__main__":
    key = jax.random.PRNGKey(0)

    # Small NCHW-like input, reduce over channels (dim=1) — matches the module.
    x = jax.random.normal(key, (2, 4, 16, 16), dtype=jnp.float32)
    dim = 1
    values, indices = jax.block_until_ready(min_with_index(x, dim))
    ref_v = jnp.min(x, axis=dim)
    ref_i = jnp.argmin(x, axis=dim).astype(jnp.int32)
    assert values.shape == ref_v.shape and indices.shape == ref_i.shape
    assert jnp.allclose(values, ref_v)
    assert jnp.array_equal(indices, ref_i)

    # Last-dim reduction (post == 1, lane-sparse path).
    x2 = jax.random.normal(jax.random.PRNGKey(1), (2, 8, 32), dtype=jnp.float32)
    v2, i2 = jax.block_until_ready(min_with_index(x2, -1))
    assert jnp.allclose(v2, jnp.min(x2, axis=-1))
    assert jnp.array_equal(i2, jnp.argmin(x2, axis=-1).astype(jnp.int32))

    # NaN propagation: value is NaN and the index is the FIRST NaN (torch.min).
    xn = jax.random.normal(jax.random.PRNGKey(2), (2, 8, 4), dtype=jnp.float32)
    xn = xn.at[0, 3, 2].set(jnp.nan).at[0, 5, 2].set(jnp.nan).at[1, 0, 0].set(jnp.nan)
    vn, idxn = jax.block_until_ready(min_with_index(xn, 1))
    clean = jnp.where(jnp.isnan(xn), jnp.inf, xn)
    exp_v = jnp.min(clean, axis=1)
    exp_i = jnp.argmin(clean, axis=1).astype(jnp.int32)
    exp_v = exp_v.at[0, 2].set(jnp.nan).at[1, 0].set(jnp.nan)
    exp_i = exp_i.at[0, 2].set(3).at[1, 0].set(0)
    assert jnp.array_equal(vn, exp_v, equal_nan=True)
    assert jnp.array_equal(idxn, exp_i)

    print("KERNEL_OK")
</pallas_src>

<mosaic_0001>
module attributes {stable_mosaic.version = 11 : i64} {
  func.func @kernel(%arg0: i32, %arg1: i32, %arg2: i32, %arg3: memref<2x4x256xf32, #tpu.memory_space<vmem>>, %arg4: memref<2x256xf32, #tpu.memory_space<vmem>>, %arg5: memref<2x256xi32, #tpu.memory_space<vmem>>) attributes {dimension_semantics = [#tpu.dimension_semantics<parallel>, #tpu.dimension_semantics<parallel>, #tpu.dimension_semantics<arbitrary>], iteration_bounds = array<i64: 1, 1, 1>, scalar_prefetch = 0 : i64, scratch_operands = 0 : i64, tpu.core_type = #tpu.core_type<tc>, window_params = [{transform_indices = @transform_0, window_bounds = array<i64: 2, 4, 256>}, {transform_indices = @transform_1, window_bounds = array<i64: 2, 256>}, {transform_indices = @transform_2, window_bounds = array<i64: 2, 256>}]} {
    %c0 = arith.constant 0 : index
    %c0_0 = arith.constant 0 : index
    %c0_1 = arith.constant 0 : index
    %0 = vector.load %arg3[%c0, %c0_0, %c0_1] : memref<2x4x256xf32, #tpu.memory_space<vmem>>, vector<2x4x256xf32>
    %1 = tpu.iota {dimensions = array<i32: 1>} : vector<2x4x256xi32>
    %cst = arith.constant dense<0x7F800000> : vector<2x256xf32>
    %2 = vector.multi_reduction <minimumf>, %0, %cst [1] : vector<2x4x256xf32> to vector<2x256xf32>
    %3 = vector.shape_cast %2 : vector<2x256xf32> to vector<2x1x256xf32>
    %4 = arith.cmpf one, %0, %0 : vector<2x4x256xf32>
    %c0_i32 = arith.constant 0 : i32
    %c1_i32 = arith.constant 1 : i32
    %5 = vector.broadcast %c0_i32 : i32 to vector<2x4x256xi32>
    %6 = vector.broadcast %c1_i32 : i32 to vector<2x4x256xi32>
    %7 = arith.select %4, %5, %6 : vector<2x4x256xi1>, vector<2x4x256xi32>
    %cst_2 = arith.constant dense<2147483647> : vector<2x256xi32>
    %8 = vector.multi_reduction <minsi>, %7, %cst_2 [1] : vector<2x4x256xi32> to vector<2x256xi32>
    %9 = vector.shape_cast %8 : vector<2x256xi32> to vector<2x1x256xi32>
    %c0_i32_3 = arith.constant 0 : i32
    %10 = vector.broadcast %c0_i32_3 : i32 to vector<2x1x256xi32>
    %11 = arith.cmpi eq, %9, %10 : vector<2x1x256xi32>
    %cst_4 = arith.constant 0x7FC00000 : f32
    %12 = vector.broadcast %cst_4 : f32 to vector<2x1x256xf32>
    %13 = arith.select %11, %12, %3 : vector<2x1x256xi1>, vector<2x1x256xf32>
    %14 = vector.broadcast %13 : vector<2x1x256xf32> to vector<2x4x256xf32>
    %15 = arith.cmpf oeq, %0, %14 : vector<2x4x256xf32>
    %16 = arith.ori %15, %4 : vector<2x4x256xi1>
    %c4_i32 = arith.constant 4 : i32
    %17 = vector.broadcast %c4_i32 : i32 to vector<2x4x256xi32>
    %18 = arith.select %16, %1, %17 : vector<2x4x256xi1>, vector<2x4x256xi32>
    %cst_5 = arith.constant dense<2147483647> : vector<2x256xi32>
    %19 = vector.multi_reduction <minsi>, %18, %cst_5 [1] : vector<2x4x256xi32> to vector<2x256xi32>
    %20 = vector.shape_cast %13 : vector<2x1x256xf32> to vector<2x256xf32>
    %c0_6 = arith.constant 0 : index
    %c0_7 = arith.constant 0 : index
    %21 = vector.load %arg4[%c0_6, %c0_7] : memref<2x256xf32, #tpu.memory_space<vmem>>, vector<2x256xf32>
    tpu.vector_store %arg4[%c0_6, %c0_7], %20 {strides = array<i32>} : memref<2x256xf32, #tpu.memory_space<vmem>>, vector<2x256xf32>,
    %c0_8 = arith.constant 0 : index
    %c0_9 = arith.constant 0 : index
    %22 = vector.load %arg5[%c0_8, %c0_9] : memref<2x256xi32, #tpu.memory_space<vmem>>, vector<2x256xi32>
    tpu.vector_store %arg5[%c0_8, %c0_9], %19 {strides = array<i32>} : memref<2x256xi32, #tpu.memory_space<vmem>>, vector<2x256xi32>,
    return
  }
  func.func @transform_0(%arg0: i32, %arg1: i32, %arg2: i32) -> (i32, i32, i32) {
    %c0_i32 = arith.constant 0 : i32
    return %arg0, %arg2, %arg1 : i32, i32, i32
  }
  func.func @transform_1(%arg0: i32, %arg1: i32, %arg2: i32) -> (i32, i32) {
    %c0_i32 = arith.constant 0 : i32
    return %arg0, %arg1 : i32, i32
  }
  func.func @transform_2(%arg0: i32, %arg1: i32, %arg2: i32) -> (i32, i32) {
    %c0_i32 = arith.constant 0 : i32
    return %arg0, %arg1 : i32, i32
  }
}

</mosaic_0001>

<bundles_post_ra>
// kernel: tpu_custom_call.1
= control target key start
LH: loop header
LB: loop body
LE: loop exit
PB: predicated region body
PF: predicated region fallthrough
CT: control target
= control target key end

     0   :  { %8 = vsyncpa [#allocation3], 0  ;;  %s431_s0 = inlined_call_operand.hbm [shape: f32[2,4,256], index: 0, kind: input, shape index: {}]   ;;  %s432_s1 = inlined_call_operand.hbm [shape: f32[2,256], index: 1, kind: output, shape index: {0}]   ;;  %s433_s2 = inlined_call_operand.hbm [shape: s32[2,256], index: 2, kind: output, shape index: {1}]  }
   0x1   :  { %9 = vsyncpa [#allocation4], 0 }
   0x2   :  { %10 = vsyncpa [#allocation7], 0  ;;  %s340_s9 = smov [#allocation2]  }
   0x3   :  { %s16_s10 = sshll.u32 %s340_s9, 4  ;;  %s17_s10 = int_to_ptr.vmem [resolvable:$true] %s16_s10 }
   0x4   :  { %s282_s11 = scalar_lea.vmem %s17_s10, 256  ;;  %p287_p1 = scmp.lt.s32.totalorder %s17_s10, %s17_s10 }
   0x5   :  { %p283_p0 = scmp.ne.s32.totalorder %s17_s10, %s282_s11  ;;  %p288_p2 = scmp.lt.s32.totalorder %s282_s11, %s282_s11 }
   0x7   :  { %p289_p3 = por %p288_p2, %p287_p1 }
   0x9   :  { %p290_p4 = pnand %p289_p3, %p283_p0 }
   0xb   :  { %293 = shalt.err (!%p290_p4)
}
   0xc   :  { %s341_s12 = smov 128   ;;  %s342_s13 = smov 8  }
   0xd   :  { %22 = dma.hbm_to_vmem [thread:$0]  %s431_s0, 256, %s17_s10, [#allocation3], %s341_s12, %s341_s12, %s342_s13  }
   0xe   :  { %334 = dma.done.wait [#allocation3], 256  }
   0xf   :  { %335 = vsyncadd [#allocation3], 4294967040  ;;  %v28_v0 = vlaneseq  ;;  %vm36_vm0 = vcmask 1043456   ;;  %v366_v1 = vld [vmem:[#allocation2] sm:$0xff]  ;;  %v368_v2 = vld [vmem:[#allocation2 + $0x8] sm:$0xff]  ;;  %v345_v16 = vmov 1  }
  0x10   :  { %v343_v4 = vmov 839922192   ;;  %v344_v6 = vmov 1983009808   ;;  %v32_v8 = vcombine.high %v366_v1, %v366_v1  ;;  %v33_v9 = vcombine.high %v368_v2, %v368_v2  ;;  %s346_s0 = smov [#allocation5]  }
  0x11   :  { %v370_v3 = vshrl.u32 %v28_v0, 7  ;;  %v132_v5 = vunpack.c.l.s4 %v343_v4  ;;  %v183_v7 = vunpack.c.l.s4 %v344_v6  ;;  %v37_v10 = vsel %vm36_vm0, %v366_v1, inf  ;;  %s241_s16 = sshll.u32 %s346_s0, 4  ;;  %s242_s16 = int_to_ptr.vmem [resolvable:$true] %s241_s16 }
  0x12   :  { %v51_v11 = vsel %vm36_vm0, %v368_v2, inf  ;;  %v38_v12 = vrot.slane %v37_v10, 4  ;;  %vm65_vm1 = vcmp.ne.f32.partialorder %v366_v1, %v366_v1  ;;  %vm66_vm2 = vcmp.ne.f32.partialorder %v368_v2, %v368_v2  ;;  %s294_s17 = scalar_lea.vmem %s242_s16, 64  ;;  %p299_p6 = scmp.lt.s32.totalorder %s242_s16, %s242_s16 }
  0x13   :  { %v52_v13 = vrot.slane %v51_v11, 4  ;;  %v44_v14 = vsel %vm36_vm0, %v32_v8, inf  ;;  %v58_v15 = vsel %vm36_vm0, %v33_v9, inf  ;;  %v67_v17 = vsel %vm65_vm1, 0, %v345_v16  ;;  %p295_p5 = scmp.ne.s32.totalorder %s242_s16, %s294_s17  ;;  %p300_p7 = scmp.lt.s32.totalorder %s294_s17, %s294_s17 }
  0x14   :  { %v68_v18 = vsel %vm66_vm2, 0, %v345_v16  ;;  %v39_v19 = vmin.f32 %v37_v10, %v38_v12  ;;  %v45_v20 = vrot.slane %v44_v14, 4  ;;  %v59_v22 = vrot.slane %v58_v15, 4 }
  0x15   :  { %v53_v21 = vmin.f32 %v51_v11, %v52_v13  ;;  %v69_v23 = vcombine.high %v67_v17, %v67_v17  ;;  %v70_v24 = vcombine.high %v68_v18, %v68_v18  ;;  %v71_v25 = vsel %vm36_vm0, %v67_v17, 2147483647  ;;  %p301_p8 = por %p300_p7, %p299_p6 }
  0x16   :  { %v91_v26 = vsel %vm36_vm0, %v68_v18, 2147483647  ;;  %v40_v27 = vrot.slane %v39_v19, 2  ;;  %v46_v28 = vmin.f32 %v44_v14, %v45_v20  ;;  %v60_v30 = vmin.f32 %v58_v15, %v59_v22 }
  0x17   :  { %v54_v29 = vrot.slane %v53_v21, 2  ;;  %v72_v31 = vrot.slane %v71_v25, 4  ;;  %v81_v32 = vsel %vm36_vm0, %v69_v23, 2147483647  ;;  %v92_v33 = vrot.slane %v91_v26, 4  ;;  %p302_p9 = pnand %p301_p8, %p295_p5 }
  0x18   :  { %v101_v34 = vsel %vm36_vm0, %v70_v24, 2147483647  ;;  %v47_v35 = vrot.slane %v46_v28, 2  ;;  %v61_v36 = vrot.slane %v60_v30, 2  ;;  %v133_v37 = vunpack.c.0.s8 %v132_v5 }
  0x19   :  { %v184_v38 = vunpack.c.0.s8 %v183_v7  ;;  %vm73_vm3 = vcmp.lt.s32.totalorder %v71_v25, %v72_v31  ;;  %v82_v39 = vrot.slane %v81_v32, 4  ;;  %vm93_vm4 = vcmp.lt.s32.totalorder %v91_v26, %v92_v33 }
  0x1a   :  { %v102_v40 = vrot.slane %v101_v34, 4  ;;  %v41_v41 = vmin.f32 %v39_v19, %v40_v27  ;;  %v48_v42 = vmin.f32 %v46_v28, %v47_v35  ;;  %v55_v43 = vmin.f32 %v53_v21, %v54_v29 }
  0x1b   :  { %v62_v44 = vmin.f32 %v60_v30, %v61_v36  ;;  %v74_v45 = vsel %vm73_vm3, %v71_v25, %v72_v31  ;;  %vm83_vm5 = vcmp.lt.s32.totalorder %v81_v32, %v82_v39  ;;  %v94_v46 = vsel %vm93_vm4, %v91_v26, %v92_v33 }
  0x1c   :  { %vm103_vm6 = vcmp.lt.s32.totalorder %v101_v34, %v102_v40  ;;  %v136_v47 = vsub.s32 %v133_v37, %v370_v3  ;;  %v398_v48 = vsub.s32 %v184_v38, %v370_v3  ;;  %v75_v49 = vrot.slane %v74_v45, 2 }
  0x1d   :  { %v84_v50 = vsel %vm83_vm5, %v81_v32, %v82_v39  ;;  %v95_v51 = vrot.slane %v94_v46, 2  ;;  %v104_v52 = vsel %vm103_vm6, %v101_v34, %v102_v40  ;;  %v42_v53 = vrot.slane %v41_v41, 1 }
  0x1e   :  { %v56_v54 = vrot.slane %v55_v43, 1  ;;  %v85_v55 = vrot.slane %v84_v50, 2  ;;  %v105_v56 = vrot.slane %v104_v52, 2  ;;  %v49_v57 = vrot.slane %v48_v42, 1 }
  0x1f   :  { %v63_v58 = vrot.slane %v62_v44, 1  ;;  %vm76_vm7 = vcmp.lt.s32.totalorder %v74_v45, %v75_v49  ;;  %vm96_vm8 = vcmp.lt.s32.totalorder %v94_v46, %v95_v51  ;;  %v43_v4 = vmin.f32 %v41_v41, %v42_v53 }
  0x20   :  { %v77_v59 = vsel %vm76_vm7, %v74_v45, %v75_v49  ;;  %vm86_vm9 = vcmp.lt.s32.totalorder %v84_v50, %v85_v55  ;;  %v97_v60 = vsel %vm96_vm8, %v94_v46, %v95_v51  ;;  %vm106_vm10 = vcmp.lt.s32.totalorder %v104_v52, %v105_v56 }
  0x21   :  { %v78_v61 = vrot.slane %v77_v59, 1  ;;  %v87_v62 = vsel %vm86_vm9, %v84_v50, %v85_v55  ;;  %v98_v63 = vrot.slane %v97_v60, 1  ;;  %v107_v0 = vsel %vm106_vm10, %v104_v52, %v105_v56 }
  0x22   :  { %v57_v5 = vmin.f32 %v55_v43, %v56_v54  ;;  %v88_v6 = vrot.slane %v87_v62, 1  ;;  %v108_v7 = vrot.slane %v107_v0, 1  ;;  %v50_v8 = vmin.f32 %v48_v42, %v49_v57 }
  0x23   :  { %v64_v9 = vmin.f32 %v62_v44, %v63_v58  ;;  %vm79_vm11 = vcmp.lt.s32.totalorder %v77_v59, %v78_v61  ;;  %vm99_vm12 = vcmp.lt.s32.totalorder %v97_v60, %v98_v63  ;;  %v137_v20 = vrot.slane %v370_v3, %v136_v47 }
  0x24   :  { %v80_v10 = vsel %vm79_vm11, %v77_v59, %v78_v61  ;;  %vm89_vm13 = vcmp.lt.s32.totalorder %v87_v62, %v88_v6  ;;  %v100_v11 = vsel %vm99_vm12, %v97_v60, %v98_v63  ;;  %vm109_vm14 = vcmp.lt.s32.totalorder %v107_v0, %v108_v7 }
  0x25   :  { %v90_v12 = vsel %vm89_vm13, %v87_v62, %v88_v6  ;;  %v110_v13 = vsel %vm109_vm14, %v107_v0, %v108_v7  ;;  %vm111_vm15 = vcmp.eq.s32.totalorder %v80_v10, 0  ;;  %vm113_vm3 = vcmp.eq.s32.totalorder %v100_v11, 0 }
  0x26   :  { %vm112_vm4 = vcmp.eq.s32.totalorder %v90_v12, 0  ;;  %vm114_vm5 = vcmp.eq.s32.totalorder %v110_v13, 0  ;;  %v115_v14 = vsel %vm111_vm15, nan, %v43_v4  ;;  %v117_v15 = vsel %vm113_vm3, nan, %v57_v5 }
  0x27   :  { %v116_v16 = vsel %vm112_vm4, nan, %v50_v8  ;;  %v118_v17 = vsel %vm114_vm5, nan, %v64_v9  ;;  %vm201_vm9 = vcmask 1041409   ;;  %vm203_vm11 = vcmask 1043459  }
  0x28   :  { %v123_v18 = vcombine.low %v115_v14, %v116_v16  ;;  %v124_v19 = vcombine.low %v117_v15, %v118_v17  ;;  %vm205_vm12 = vcmask 1045509   ;;  %vm207_vm13 = vcmask 1047559  }
  0x2a   :  { %vm127_vm6 = vcmp.eq.f32.partialorder %v366_v1, %v123_v18  ;;  %vm128_vm7 = vcmp.eq.f32.partialorder %v368_v2, %v124_v19  ;;  %v188_v21 = vrot.slane %v123_v18, %v398_v48  ;;  %v195_v22 = vrot.slane %v124_v19, %v398_v48 }
  0x2b   :  { %vm129_vm8 = vmor %vm127_vm6, %vm65_vm1 }
  0x2c   :  { %vm130_vm10 = vmor %vm128_vm7, %vm66_vm2  ;;  %v138_v23 = vsel %vm129_vm8, %v137_v20, 4  ;;  %v200_v24 = vrot.slane %v195_v22, 7 }
  0x2d   :  { %v139_v3 = vsel %vm130_vm10, %v137_v20, 4  ;;  %v140_v25 = vcombine.high %v138_v23, %v138_v23  ;;  %v142_v26 = vsel %vm36_vm0, %v138_v23, 2147483647 }
  0x2e   :  { %v141_v27 = vcombine.high %v139_v3, %v139_v3  ;;  %v143_v28 = vrot.slane %v142_v26, 4  ;;  %v162_v1 = vsel %vm36_vm0, %v139_v3, 2147483647  ;;  %v202_v29 = vsel %vm201_vm9, %v200_v24, %v188_v21 }
  0x2f   :  { %v152_v2 = vsel %vm36_vm0, %v140_v25, 2147483647  ;;  %v163_v30 = vrot.slane %v162_v1, 4  ;;  %v204_v31 = vsel %vm203_vm11, %v200_v24, %v202_v29 }
  0x30   :  { %vm144_vm1 = vcmp.lt.s32.totalorder %v142_v26, %v143_v28  ;;  %v153_v32 = vrot.slane %v152_v2, 4  ;;  %v172_v33 = vsel %vm36_vm0, %v141_v27, 2147483647  ;;  %v206_v34 = vsel %vm205_vm12, %v200_v24, %v204_v31 }
  0x31   :  { %vm164_vm2 = vcmp.lt.s32.totalorder %v162_v1, %v163_v30  ;;  %v173_v35 = vrot.slane %v172_v33, 4  ;;  %v208_v36 = vsel %vm207_vm13, %v200_v24, %v206_v34  ;;  %v145_v37 = vsel %vm144_vm1, %v142_v26, %v143_v28 }
  0x32   :  { %210 = vst [vmem:[#allocation5] sm:$0xf] %v208_v36  ;;  %v146_v38 = vrot.slane %v145_v37, 2  ;;  %vm154_vm14 = vcmp.lt.s32.totalorder %v152_v2, %v153_v32  ;;  %v165_v39 = vsel %vm164_vm2, %v162_v1, %v163_v30 }
  0x33   :  { %v155_v40 = vsel %vm154_vm14, %v152_v2, %v153_v32  ;;  %v166_v41 = vrot.slane %v165_v39, 2  ;;  %vm174_vm15 = vcmp.lt.s32.totalorder %v172_v33, %v173_v35 }
  0x34   :  { %305 = shalt.err (!%p302_p9)
}
  0x35   :  { %244 = dma.vmem_to_hbm [thread:$0]  %s242_s16, 64, %s432_s1, [#allocation4]   ;;  %vm147_vm0 = vcmp.lt.s32.totalorder %v145_v37, %v146_v38  ;;  %v156_v42 = vrot.slane %v155_v40, 2  ;;  %v175_v43 = vsel %vm174_vm15, %v172_v33, %v173_v35  ;;  %vm167_vm3 = vcmp.lt.s32.totalorder %v165_v39, %v166_v41 }
  0x36   :  { %v148_v44 = vsel %vm147_vm0, %v145_v37, %v146_v38  ;;  %v176_v45 = vrot.slane %v175_v43, 2  ;;  %v168_v47 = vsel %vm167_vm3, %v165_v39, %v166_v41  ;;  %s347_s1 = smov [#allocation6]  }
  0x37   :  { %v149_v46 = vrot.slane %v148_v44, 1  ;;  %vm157_vm4 = vcmp.lt.s32.totalorder %v155_v40, %v156_v42  ;;  %v169_v50 = vrot.slane %v168_v47, 1  ;;  %s251_s20 = sshll.u32 %s347_s1, 4  ;;  %s252_s20 = int_to_ptr.vmem [resolvable:$true] %s251_s20 }
  0x38   :  { %v158_v49 = vsel %vm157_vm4, %v155_v40, %v156_v42  ;;  %vm177_vm5 = vcmp.lt.s32.totalorder %v175_v43, %v176_v45  ;;  %s314_s21 = scalar_lea.vmem %s252_s20, 64  ;;  %p319_p11 = scmp.lt.s32.totalorder %s252_s20, %s252_s20 }
  0x39   :  { %vm150_vm6 = vcmp.lt.s32.totalorder %v148_v44, %v149_v46  ;;  %v159_v51 = vrot.slane %v158_v49, 1  ;;  %v178_v52 = vsel %vm177_vm5, %v175_v43, %v176_v45  ;;  %vm170_vm7 = vcmp.lt.s32.totalorder %v168_v47, %v169_v50  ;;  %p315_p10 = scmp.ne.s32.totalorder %s252_s20, %s314_s21  ;;  %p320_p12 = scmp.lt.s32.totalorder %s314_s21, %s314_s21 }
  0x3a   :  { %v151_v53 = vsel %vm150_vm6, %v148_v44, %v149_v46  ;;  %v179_v54 = vrot.slane %v178_v52, 1  ;;  %v171_v55 = vsel %vm170_vm7, %v168_v47, %v169_v50 }
  0x3b   :  { %vm160_vm8 = vcmp.lt.s32.totalorder %v158_v49, %v159_v51  ;;  %p321_p13 = por %p320_p12, %p319_p11 }
  0x3c   :  { %v161_v56 = vsel %vm160_vm8, %v158_v49, %v159_v51  ;;  %vm180_vm10 = vcmp.lt.s32.totalorder %v178_v52, %v179_v54 }
  0x3d   :  { %v181_v57 = vsel %vm180_vm10, %v178_v52, %v179_v54  ;;  %v211_v58 = vcombine.low %v151_v53, %v161_v56  ;;  %p322_p0 = pnand %p321_p13, %p315_p10 }
  0x3e   :  { %v219_v59 = vcombine.low %v171_v55, %v181_v57 }
  0x3f   :  { %v218_v60 = vrot.slane %v211_v58, %v398_v48 }
  0x40   :  { %v226_v61 = vrot.slane %v219_v59, %v398_v48 }
  0x42   :  { %v229_v62 = vrot.slane %v226_v61, 7 }
  0x44   :  { %v230_v63 = vsel %vm201_vm9, %v229_v62, %v218_v60 }
  0x45   :  { %v231_v0 = vsel %vm203_vm11, %v229_v62, %v230_v63 }
  0x46   :  { %v232_v4 = vsel %vm205_vm12, %v229_v62, %v231_v0 }
  0x47   :  { %v233_v5 = vsel %vm207_vm13, %v229_v62, %v232_v4 }
  0x48   :  { %234 = vst [vmem:[#allocation6] sm:$0xf] %v233_v5 }
  0x49   :  { %325 = shalt.err (!%p322_p0)
}
  0x4a   :  { %254 = dma.vmem_to_hbm [thread:$0]  %s252_s20, 64, %s433_s2, [#allocation7]  }
  0x4b   :  { %336 = dma.done.wait [#allocation4], 64  }
  0x4c   :  { %337 = vsyncadd [#allocation4], 4294967232 }
  0x4d   :  { %338 = dma.done.wait [#allocation7], 64  }
  0x4e   :  { %339 = vsyncadd [#allocation7], 4294967232 }
  0x4f   :  { %261 = vsyncpa [#allocation3], 1 }
  0x50   :  { %262 = vsyncpa [#allocation4], 1 }
  0x51   :  { %263 = vsyncpa [#allocation7], 1 }

</bundles_post_ra>
